<compile_context>
chip_gen: v7x
topology: tpu7x:2x2x1
jax: 0.10.0
libtpu: 0.0.40
codegen_flags: <defaults>
</compile_context>

<pallas_src>
import functools

import numpy as np

import jax
import jax.numpy as jnp
from jax import lax
from jax.experimental import pallas as pl
from jax.experimental.pallas import tpu as pltpu


def _round_up(x, m):
    return (x + m - 1) // m * m


# ---------------------------------------------------------------------------
# Kernels
# ---------------------------------------------------------------------------

def _fused_ohead_kernel(x_ref, w_ref, o_ref):
    # x_ref: (tb, E)    embedding tile (streamed over the batch)
    # w_ref: (E, CNp)   contraction-major packed weights (resident, tiny)
    # o_ref: (tb, CNp)  lane-dense fused logits slab (CNp % 128 == 0)
    o_ref[...] = jnp.dot(
        x_ref[...], w_ref[...], preferred_element_type=jnp.float32
    ).astype(o_ref.dtype)


def _single_head_kernel(idx_ref, x_ref, w_ref, o_ref):
    # idx_ref: SMEM scalar-prefetch (1,) head index (already consumed by the
    #          weight index_map; unused in the body)
    # x_ref:   (tb, E)   embedding tile
    # w_ref:   (E, Np)   chosen head's packed weights (head dim squeezed)
    # o_ref:   (tb, Np)  lane-dense logits (Np % 128 == 0)
    del idx_ref
    o_ref[...] = jnp.dot(
        x_ref[...], w_ref[...], preferred_element_type=jnp.float32
    ).astype(o_ref.dtype)


# ---------------------------------------------------------------------------
# pallas_call wrappers
# ---------------------------------------------------------------------------

def _batch_tile(B, max_tile_b):
    tb = min(_round_up(max(B, 1), 8), max_tile_b)
    return tb, _round_up(B, tb)


def _ohead_fused_matmul(embedding, w_packed, max_tile_b=1024):
    """embedding: (B, E); w_packed: (E, CNp), CNp % 128 == 0  ->  (B, CNp) f32."""
    B, E = embedding.shape
    E2, CNp = w_packed.shape
    assert E == E2 and CNp % 128 == 0

    tb, B_pad = _batch_tile(B, max_tile_b)
    x = embedding
    if B_pad != B:
        x = jnp.pad(x, ((0, B_pad - B), (0, 0)))

    out = pl.pallas_call(
        _fused_ohead_kernel,
        out_shape=jax.ShapeDtypeStruct((B_pad, CNp), jnp.float32),
        grid_spec=pltpu.PrefetchScalarGridSpec(
            num_scalar_prefetch=0,
            grid=(B_pad // tb,),
            in_specs=[
                # Streamed embedding tiles over the batch.
                pl.BlockSpec((tb, E), lambda i: (i, 0)),
                # Packed weights: resident across all grid steps.
                pl.BlockSpec((E, CNp), lambda i: (0, 0)),
            ],
            out_specs=pl.BlockSpec((tb, CNp), lambda i: (i, 0)),
        ),
        compiler_params=pltpu.CompilerParams(
            dimension_semantics=("parallel",)
        ),
    )(x, w_packed)
    return out[:B]


def _ohead_single_matmul(embedding, w_heads_packed, idx, max_tile_b=1024):
    """embedding: (B, E); w_heads_packed: (C, E, Np); idx: int32 -> (B, Np) f32."""
    B, E = embedding.shape
    C, E2, Np = w_heads_packed.shape
    assert E == E2 and Np % 128 == 0

    tb, B_pad = _batch_tile(B, max_tile_b)
    x = embedding
    if B_pad != B:
        x = jnp.pad(x, ((0, B_pad - B), (0, 0)))

    idx_arr = jnp.asarray(idx, jnp.int32).reshape((1,))

    out = pl.pallas_call(
        _single_head_kernel,
        out_shape=jax.ShapeDtypeStruct((B_pad, Np), jnp.float32),
        grid_spec=pltpu.PrefetchScalarGridSpec(
            num_scalar_prefetch=1,
            grid=(B_pad // tb,),
            in_specs=[
                # Streamed embedding tiles over the batch.
                pl.BlockSpec((tb, E), lambda i, idx_ref: (i, 0)),
                # Only the selected head's packed weights are DMA'd; the head
                # dim is squeezed out, index comes from scalar prefetch.
                pl.BlockSpec((None, E, Np),
                             lambda i, idx_ref: (idx_ref[0], 0, 0)),
            ],
            out_specs=pl.BlockSpec((tb, Np), lambda i, idx_ref: (i, 0)),
        ),
        compiler_params=pltpu.CompilerParams(
            dimension_semantics=("parallel",)
        ),
    )(idx_arr, x, w_heads_packed)
    return out[:B]


# ---------------------------------------------------------------------------
# jitted entry points
# ---------------------------------------------------------------------------

@functools.partial(
    jax.jit, static_argnames=("num_classifiers", "num_classes", "max_tile_b")
)
def ohead_all_logits(embedding, w_packed, *, num_classifiers, num_classes,
                     max_tile_b=1024):
    """All-heads logits as a stacked (C, B, N) f32 array."""
    B = embedding.shape[0]
    out = _ohead_fused_matmul(embedding, w_packed, max_tile_b)       # (B, CNp)
    cn = num_classifiers * num_classes
    out = out[:, :cn].reshape(B, num_classifiers, num_classes)
    return jnp.transpose(out, (1, 0, 2))                             # (C, B, N)


@functools.partial(jax.jit, static_argnames=("num_classes", "max_tile_b"))
def ohead_single_logits(embedding, w_heads_packed, idx, *, num_classes,
                        max_tile_b=1024):
    """Single-head logits. w_heads_packed: (C, E, Np); idx: int32 (may be traced)."""
    out = _ohead_single_matmul(embedding, w_heads_packed, idx, max_tile_b)
    return out[:, :num_classes]


# ---------------------------------------------------------------------------
# Module wrapper
# ---------------------------------------------------------------------------

class OheadPallas:
    """JAX/Pallas port of the PyTorch Ohead module (forward pass only)."""

    def __init__(self, embedding_size=512, num_classes=10, num_classifiers=10,
                 key=None, compute_dtype=jnp.float32, max_tile_b=1024):
        self.embedding_size = embedding_size
        self.num_classes = num_classes
        self.num_classifiers = num_classifiers
        self.compute_dtype = compute_dtype
        self.max_tile_b = max_tile_b

        key = jax.random.PRNGKey(0) if key is None else key
        w_key, self._rng = jax.random.split(key)

        # Deterministic synthetic init (mimics Kaiming-uniform scale of nn.Linear).
        bound = 1.0 / np.sqrt(embedding_size)
        self.weights = jax.random.uniform(
            w_key, (num_classifiers, num_classes, embedding_size),
            dtype=jnp.float32, minval=-bound, maxval=bound)

        E, C, N = embedding_size, num_classifiers, num_classes

        # Fused packing (done ONCE): (E, C*N) contraction-major, padded on the
        # lane axis to a multiple of 128 -> lane-dense MXU output, no in-kernel
        # transpose, no masked vst.
        cn = C * N
        cnp = _round_up(cn, 128)
        w_t = jnp.transpose(self.weights, (2, 0, 1)).reshape(E, cn)
        self._w_packed = (
            jnp.zeros((E, cnp), jnp.float32)
            .at[:, :cn].set(w_t)
            .astype(compute_dtype)
        )

        # Per-head packing (done ONCE): (C, E, Np) contraction-major, each
        # head lane-padded, so the single-head path needs no per-call
        # transpose/pad/dynamic-slice -- just a scalar-prefetched index.
        npad = _round_up(N, 128)
        w_heads = jnp.transpose(self.weights, (0, 2, 1))              # (C, E, N)
        self._w_heads_packed = (
            jnp.zeros((C, E, npad), jnp.float32)
            .at[:, :, :N].set(w_heads)
            .astype(compute_dtype)
        )

    def forward(self, embedding, forward_type=0, rng=None, as_list=True):
        x = embedding.astype(self.compute_dtype)
        if forward_type == "all":
            stacked = ohead_all_logits(
                x, self._w_packed,
                num_classifiers=self.num_classifiers,
                num_classes=self.num_classes,
                max_tile_b=self.max_tile_b)
            if as_list:
                # Matches PyTorch: python list of (B, num_classes) arrays.
                # (Pass as_list=False to get the stacked (C, B, N) slab and
                #  skip the C per-head slice dispatches.)
                return [stacked[i] for i in range(self.num_classifiers)]
            return stacked
        elif forward_type == "random":
            if rng is None:
                self._rng, rng = jax.random.split(self._rng)
            # Index stays on-device; no host sync, only the chosen head's
            # weights are DMA'd / computed.
            idx = jax.random.randint(rng, (), 0, self.num_classifiers)
            return ohead_single_logits(x, self._w_heads_packed, idx,
                                       num_classes=self.num_classes,
                                       max_tile_b=self.max_tile_b)
        else:
            idx = jnp.int32(forward_type)
            return ohead_single_logits(x, self._w_heads_packed, idx,
                                       num_classes=self.num_classes,
                                       max_tile_b=self.max_tile_b)

    __call__ = forward


if __name__ == "__main__":
    key = jax.random.PRNGKey(0)
    k_emb, k_w, k_rnd = jax.random.split(key, 3)

    batch = 8
    embedding_size = 128
    num_classes = 10
    num_classifiers = 4

    head = OheadPallas(embedding_size=embedding_size,
                       num_classes=num_classes,
                       num_classifiers=num_classifiers,
                       key=k_w)

    embedding = jax.random.normal(k_emb, (batch, embedding_size), dtype=jnp.float32)

    # forward_type='all'
    all_logits = head(embedding, forward_type="all")
    all_logits = [jax.block_until_ready(l) for l in all_logits]

    # forward_type=int (selected head -- scalar-prefetched single-head path)
    sel = jax.block_until_ready(head(embedding, forward_type=2))

    # forward_type='random' (on-device index, single-head path)
    rnd = jax.block_until_ready(head(embedding, forward_type="random", rng=k_rnd))

    # Pure-JAX reference checks (f32 path must match tightly).
    ref = jnp.einsum("be,cne->cbn", embedding, head.weights)
    got = jnp.stack(all_logits, axis=0)
    np.testing.assert_allclose(np.asarray(got), np.asarray(ref), rtol=1e-5, atol=1e-5)
    np.testing.assert_allclose(np.asarray(sel), np.asarray(ref[2]), rtol=1e-5, atol=1e-5)
    ridx = int(jax.random.randint(k_rnd, (), 0, num_classifiers))
    np.testing.assert_allclose(np.asarray(rnd), np.asarray(ref[ridx]),
                               rtol=1e-5, atol=1e-5)

    # bf16 compute variant (v6e/v7x-friendly: halves HBM bytes, native MXU dtype,
    # f32 accumulation) -- loose tolerance vs the f32 reference.
    head_bf16 = OheadPallas(embedding_size=embedding_size,
                            num_classes=num_classes,
                            num_classifiers=num_classifiers,
                            key=k_w, compute_dtype=jnp.bfloat16)
    got_bf16 = jax.block_until_ready(
        head_bf16(embedding, forward_type="all", as_list=False))
    np.testing.assert_allclose(np.asarray(got_bf16, np.float32), np.asarray(ref),
                               rtol=1e-1, atol=1e-1)
    sel_bf16 = jax.block_until_ready(head_bf16(embedding, forward_type=1))
    np.testing.assert_allclose(np.asarray(sel_bf16, np.float32), np.asarray(ref[1]),
                               rtol=1e-1, atol=1e-1)

    print("KERNEL_OK")
</pallas_src>

<mosaic_0001>
module attributes {stable_mosaic.version = 11 : i64} {
  func.func @_fused_ohead_kernel(%arg0: i32, %arg1: memref<8x128xf32, #tpu.memory_space<vmem>>, %arg2: memref<128x128xf32, #tpu.memory_space<vmem>>, %arg3: memref<8x128xf32, #tpu.memory_space<vmem>>) attributes {dimension_semantics = [#tpu.dimension_semantics<parallel>], iteration_bounds = array<i64: 1>, scalar_prefetch = 0 : i64, scratch_operands = 0 : i64, tpu.core_type = #tpu.core_type<tc>, window_params = [{transform_indices = @transform_0, window_bounds = array<i64: 8, 128>}, {pipeline_mode = #tpu.pipeline_mode<synchronous>, transform_indices = @transform_1, window_bounds = array<i64: 128, 128>}, {transform_indices = @transform_2, window_bounds = array<i64: 8, 128>}]} {
    %c0 = arith.constant 0 : index
    %c0_0 = arith.constant 0 : index
    %0 = vector.load %arg1[%c0, %c0_0] : memref<8x128xf32, #tpu.memory_space<vmem>>, vector<8x128xf32>
    %c0_1 = arith.constant 0 : index
    %c0_2 = arith.constant 0 : index
    %1 = vector.load %arg2[%c0_1, %c0_2] : memref<128x128xf32, #tpu.memory_space<vmem>>, vector<128x128xf32>
    %cst = arith.constant dense<0.000000e+00> : vector<8x128xf32>
    %2 = tpu.matmul %0, %1, %cst {dimension_numbers = #tpu.dot_dimension_numbers<[1], [0], [0], [1], [0, 0, 1, 1], [], []>} : vector<8x128xf32>, vector<128x128xf32>, vector<8x128xf32> -> vector<8x128xf32>
    %c0_3 = arith.constant 0 : index
    %c0_4 = arith.constant 0 : index
    %3 = vector.load %arg3[%c0_3, %c0_4] : memref<8x128xf32, #tpu.memory_space<vmem>>, vector<8x128xf32>
    tpu.vector_store %arg3[%c0_3, %c0_4], %2 {strides = array<i32>} : memref<8x128xf32, #tpu.memory_space<vmem>>, vector<8x128xf32>,
    return
  }
  func.func @transform_0(%arg0: i32) -> (i32, i32) {
    %c0_i32 = arith.constant 0 : i32
    %c0_i32_0 = arith.constant 0 : i32
    return %arg0, %c0_i32 : i32, i32
  }
  func.func @transform_1(%arg0: i32) -> (i32, i32) {
    %c0_i32 = arith.constant 0 : i32
    %c0_i32_0 = arith.constant 0 : i32
    %c0_i32_1 = arith.constant 0 : i32
    return %c0_i32, %c0_i32_0 : i32, i32
  }
  func.func @transform_2(%arg0: i32) -> (i32, i32) {
    %c0_i32 = arith.constant 0 : i32
    %c0_i32_0 = arith.constant 0 : i32
    return %arg0, %c0_i32 : i32, i32
  }
}

</mosaic_0001>

<bundles_post_ra>
// kernel: ohead_all_logits.1
= control target key start
LH: loop header
LB: loop body
LE: loop exit
PB: predicated region body
PF: predicated region fallthrough
CT: control target
= control target key end

     0   :  { %7 = vsyncpa [#allocation3], 0  ;;  %s318_s0 = inlined_call_operand.hbm [shape: f32[8,128], index: 0, kind: input, shape index: {}]   ;;  %s319_s1 = inlined_call_operand.hbm [shape: f32[128,128], index: 1, kind: input, shape index: {}]   ;;  %s320_s2 = inlined_call_operand.vmem [shape: f32[8,128], index: 2, kind: output, shape index: {}]  }
   0x1   :  { %8 = vsyncpa [#allocation5], 0  ;;  %s262_s9 = smov [#allocation2]   ;;  %s263_s11 = smov [#allocation4]  }
   0x2   :  { %s15_s10 = sshll.u32 %s262_s9, 4  ;;  %s24_s12 = sshll.u32 %s263_s11, 4  ;;  %s16_s10 = int_to_ptr.vmem [resolvable:$true] %s15_s10  ;;  %s284_s12 = int_to_ptr.vmem [resolvable:$true] %s24_s12 }
   0x3   :  { %s214_s15 = scalar_lea.hbm %s318_s0, 128 }
   0x4   :  { %p215_p0 = scmp.ne.s32.totalorder %s318_s0, %s214_s15  ;;  %p218_p1 = scmp.lt.u32.totalorder %s214_s15, %s318_s0 }
   0x6   :  { %p220_p2 = pnand %p218_p1, %p215_p0 }
   0x8   :  { %223 = shalt.err (!%p220_p2)
}
   0x9   :  { %s224_s20 = scalar_lea.vmem %s16_s10, 128  ;;  %p229_p4 = scmp.lt.s32.totalorder %s16_s10, %s16_s10 }
   0xa   :  { %p225_p3 = scmp.ne.s32.totalorder %s16_s10, %s224_s20  ;;  %p230_p5 = scmp.lt.s32.totalorder %s224_s20, %s224_s20 }
   0xc   :  { %p231_p6 = por %p230_p5, %p229_p4 }
   0xe   :  { %p232_p7 = pnand %p231_p6, %p225_p3 }
  0x10   :  { %235 = shalt.err (!%p232_p7)
}
  0x11   :  { %18 = dma.hbm_to_vmem [thread:$0]  %s318_s0, 128, %s16_s10, [#allocation3]  }
  0x12   :  { %s236_s25 = scalar_lea.hbm %s319_s1, 2048 }
  0x13   :  { %p237_p8 = scmp.ne.s32.totalorder %s319_s1, %s236_s25  ;;  %p240_p9 = scmp.lt.u32.totalorder %s236_s25, %s319_s1 }
  0x15   :  { %p242_p10 = pnand %p240_p9, %p237_p8 }
  0x17   :  { %245 = shalt.err (!%p242_p10)
}
  0x18   :  { %s246_s30 = scalar_lea.vmem %s284_s12, 2048  ;;  %p251_p12 = scmp.lt.s32.totalorder %s284_s12, %s284_s12 }
  0x19   :  { %p247_p11 = scmp.ne.s32.totalorder %s284_s12, %s246_s30  ;;  %p252_p13 = scmp.lt.s32.totalorder %s246_s30, %s246_s30 }
  0x1b   :  { %p253_p0 = por %p252_p13, %p251_p12 }
  0x1d   :  { %p254_p1 = pnand %p253_p0, %p247_p11 }
  0x1f   :  { %257 = shalt.err (!%p254_p1)
}
  0x20   :  { %s264_s0 = smov 128   ;;  %s265_s3 = smov 8  }
  0x21   :  { %30 = dma.hbm_to_vmem [thread:$0]  %s319_s1, 2048, %s284_s12, [#allocation5], %s264_s0, %s264_s0, %s265_s3  }
  0x22   :  { %258 = dma.done.wait [#allocation3], 128  }
  0x23   :  { %259 = vsyncadd [#allocation3], 4294967168 }
  0x24   :  { %260 = dma.done.wait [#allocation5], 2048  }
  0x25   :  { %261 = vsyncadd [#allocation5], 4294965248  ;;  %v266_v0 = vmov 0.0|0.0   ;;  %vm267_vm0 = vmmov 0   ;;  %v268_v1 = vmov 0.0   ;;  %v38_v2 = vld [vmem:[#allocation4] sm:$0xff] }
  0x26   :  { %183 = vmatprep.subr.bf16.mxu0 %v266_v0  ;;  %180 = vmatprep.mubr.msk.f32.mxu0 %vm267_vm0, %v268_v1  ;;  %v39_v3 = vld [vmem:[#allocation4 + $0x8] sm:$0xff]  ;;  %v40_v4 = vld [vmem:[#allocation4 + $0x10] sm:$0xff]  ;;  %v41_v6 = vld [vmem:[#allocation4 + $0x18] sm:$0xff] }
  0x27   :  { %v184_v5 = vpack.c.bf16 %v39_v3, %v38_v2  ;;  %v187_v7 = vpack.c.bf16 %v41_v6, %v40_v4  ;;  %v42_v8 = vld [vmem:[#allocation4 + $0x20] sm:$0xff]  ;;  %v43_v9 = vld [vmem:[#allocation4 + $0x28] sm:$0xff]  ;;  %v44_v11 = vld [vmem:[#allocation4 + $0x30] sm:$0xff] }
  0x28   :  { %v190_v10 = vpack.c.bf16 %v43_v9, %v42_v8  ;;  %v45_v12 = vld [vmem:[#allocation4 + $0x38] sm:$0xff]  ;;  %v46_v14 = vld [vmem:[#allocation4 + $0x40] sm:$0xff]  ;;  %v47_v15 = vld [vmem:[#allocation4 + $0x48] sm:$0xff] }
  0x29   :  { %185 = vmatpush3.bf16.msra.mxu0 %v184_v5  ;;  %v193_v13 = vpack.c.bf16 %v45_v12, %v44_v11  ;;  %v196_v16 = vpack.c.bf16 %v47_v15, %v46_v14  ;;  %v48_v17 = vld [vmem:[#allocation4 + $0x50] sm:$0xff]  ;;  %v49_v18 = vld [vmem:[#allocation4 + $0x58] sm:$0xff]  ;;  %v50_v20 = vld [vmem:[#allocation4 + $0x60] sm:$0xff] }
  0x2a   :  { %186 = vmatprep.subr.bf16.mxu0 %v266_v0  ;;  %v199_v19 = vpack.c.bf16 %v49_v18, %v48_v17  ;;  %v51_v21 = vld [vmem:[#allocation4 + $0x68] sm:$0xff]  ;;  %v52_v23 = vld [vmem:[#allocation4 + $0x70] sm:$0xff]  ;;  %v53_v24 = vld [vmem:[#allocation4 + $0x78] sm:$0xff] }
  0x2b   :  { %v202_v22 = vpack.c.bf16 %v51_v21, %v50_v20  ;;  %v205_v25 = vpack.c.bf16 %v53_v24, %v52_v23  ;;  %v37_v26 = vld [vmem:[#allocation2] sm:$0xff] }
  0x2d   :  { %188 = vmatpush3.bf16.msra.mxu0 %v187_v7 }
  0x2e   :  { %189 = vmatprep.subr.bf16.mxu0 %v266_v0 }
  0x31   :  { %191 = vmatpush3.bf16.msra.mxu0 %v190_v10 }
  0x32   :  { %192 = vmatprep.subr.bf16.mxu0 %v266_v0 }
  0x35   :  { %194 = vmatpush3.bf16.msra.mxu0 %v193_v13 }
  0x36   :  { %195 = vmatprep.subr.bf16.mxu0 %v266_v0 }
  0x39   :  { %197 = vmatpush3.bf16.msra.mxu0 %v196_v16 }
  0x3a   :  { %198 = vmatprep.subr.bf16.mxu0 %v266_v0 }
  0x3d   :  { %200 = vmatpush3.bf16.msra.mxu0 %v199_v19 }
  0x3e   :  { %201 = vmatprep.subr.bf16.mxu0 %v266_v0 }
  0x41   :  { %203 = vmatpush3.bf16.msra.mxu0 %v202_v22 }
  0x42   :  { %204 = vmatprep.subr.bf16.mxu0 %v266_v0 }
  0x45   :  { %206 = vmatpush3.bf16.msra.mxu0 %v205_v25 }
  0x48   :  { %181 = vmatmul.mubr.f32.vlgmr.msra.gmra.mrb[0].mxu0 %v37_v26 }
 0x11b   :  { %v120_v27 = vpop.f32.mrb[0].mxu0 }
 0x11c   :  { %124 = vst [vmem:[%s320_s2] sm:$0xff] %v120_v27  ;;  %v182_v28 = vpop.f32.mrb[1].mxu0 }
 0x11d   :  { %129 = vsyncpa [#allocation3], 1 }
 0x11e   :  { %130 = vsyncpa [#allocation5], 1 }

</bundles_post_ra>
